<compile_context>
chip_gen: v6e
topology: v6e:2x2x1
jax: 0.10.0
libtpu: 0.0.40
codegen_flags: <defaults>
</compile_context>

<pallas_src>
import functools

import jax
import jax.numpy as jnp
from jax import lax
from jax.experimental import pallas as pl
from jax.experimental.pallas import tpu as pltpu


def _round_up(x: int, m: int) -> int:
    return (x + m - 1) // m * m


def _self_output_kernel(x_ref, res_ref, w_ref, ln_ref, o_ref, *,
                        eps: float, fix_attention_residual: bool,
                        inv_h: float):
    # Dense (no bias). w_ref is already (H_in, H_out) (transposed once in the
    # wrapper), so this is a plain MXU matmul: operands in the activation
    # dtype, f32 accumulation.
    h = jnp.dot(x_ref[...], w_ref[...], preferred_element_type=jnp.float32)
    res = res_ref[...].astype(jnp.float32)

    # LN params packed as (4, H) f32: [gamma1, beta1, gamma2, beta2].
    g1 = ln_ref[0:1, :]
    b1 = ln_ref[1:2, :]

    def layer_norm(y, g, b):
        # Two-pass mean / variance: robust against catastrophic cancellation
        # when |mean| >> std (post-residual activations).  Cheap: kernel is
        # HBM-bandwidth bound for typical H.
        mean = jnp.sum(y, axis=-1, keepdims=True) * inv_h
        d = y - mean
        var = jnp.sum(d * d, axis=-1, keepdims=True) * inv_h
        return d * lax.rsqrt(var + eps) * g + b

    # dropout is identity in eval mode
    y = layer_norm(h + res, g1, b1)
    if not fix_attention_residual:
        g2 = ln_ref[2:3, :]
        b2 = ln_ref[3:4, :]
        y = layer_norm(y + res, g2, b2)
    o_ref[...] = y.astype(o_ref.dtype)


def ribonanzanet_self_output(hidden_states, input_tensor, dense_weight,
                             ln1_gamma, ln1_beta,
                             ln2_gamma=None, ln2_beta=None,
                             *, eps=1e-12, fix_attention_residual=False,
                             row_tile=None):
    """hidden_states, input_tensor: (B, S, H).
    dense_weight: (H_out, H_in) exactly as stored by torch.nn.Linear.
    LN params: (H,) each."""
    B, S, H = hidden_states.shape
    assert input_tensor.shape == hidden_states.shape
    assert dense_weight.shape == (H, H), (
        "RibonanzaNetSelfOutput.dense must be square (hidden_size, hidden_size); "
        f"got {dense_weight.shape} vs hidden_size={H}")

    rows = B * S
    dtype = hidden_states.dtype
    itemsize = jnp.dtype(dtype).itemsize
    # Sublane multiple for the row (second-minor) axis by activation dtype.
    sub = {1: 32, 2: 16, 4: 8}.get(itemsize, 8)

    try:
        phys_vmem = pltpu.get_tpu_info().vmem_capacity_bytes
    except Exception:
        phys_vmem = 64 << 20  # conservative: v7x per-core VMEM
    vmem_budget = phys_vmem - (16 << 20)

    def vmem_needed(tile):
        # double-buffered x / res / out tiles + weight (budget 2x in case the
        # compiler keeps it double-buffered) + LN params + f32 intermediates
        # (h, res, centered copies, ...) + misc headroom.
        return (2 * 3 * tile * H * itemsize
                + 2 * H * H * itemsize
                + 2 * 4 * H * 4
                + 6 * tile * H * 4
                + (4 << 20))

    if row_tile is None:
        # Generation-aware: largest row tile that fits the VMEM budget
        # (1024 on v5e/v6e for moderate H, drops to 512/256 on v7x / large H).
        row_tile = sub
        for cand in (1024, 512, 256, 128, 64, 32, 16, 8):
            if cand % sub == 0 and vmem_needed(cand) <= vmem_budget:
                row_tile = cand
                break
    row_tile = max(sub, _round_up(min(int(row_tile), _round_up(rows, sub)), sub))

    # Ensure >= 2 grid steps when there is enough work, so the "parallel" row
    # axis can be sharded across both TensorCores on v7x.
    if rows > sub and -(-rows // row_tile) < 2:
        row_tile = _round_up(-(-rows // 2), sub)

    grid = pl.cdiv(rows, row_tile)
    vmem_limit = int(min(max(vmem_needed(row_tile), 32 << 20),
                         max(vmem_budget, 32 << 20)))

    # No padding / slicing: Pallas handles the ragged last block (reads may see
    # stale VMEM rows, stores are masked); LayerNorm is strictly row-independent
    # so valid rows are unaffected.
    x2 = hidden_states.reshape(rows, H)
    r2 = input_tensor.reshape(rows, H)

    # One-time transpose + dtype cast of the static weight (explicit MXU input
    # dtype; no per-step in-kernel transpose).
    w_t = jnp.asarray(dense_weight).T.astype(dtype)

    if ln2_gamma is None:
        ln2_gamma = jnp.ones((H,), jnp.float32)
    if ln2_beta is None:
        ln2_beta = jnp.zeros((H,), jnp.float32)
    ln_params = jnp.stack(
        [ln1_gamma, ln1_beta, ln2_gamma, ln2_beta]).astype(jnp.float32)

    kernel = functools.partial(
        _self_output_kernel, eps=float(eps),
        fix_attention_residual=bool(fix_attention_residual),
        inv_h=1.0 / float(H))

    row_spec = pl.BlockSpec((row_tile, H), lambda i: (i, 0))

    def make_const_specs(single_buffer):
        kw = {}
        if single_buffer and hasattr(pl, "Buffered"):
            kw = dict(pipeline_mode=pl.Buffered(1))
        w_spec = pl.BlockSpec((H, H), lambda i: (0, 0), **kw)
        ln_spec = pl.BlockSpec((4, H), lambda i: (0, 0), **kw)
        return w_spec, ln_spec

    def run(w_spec, ln_spec):
        return pl.pallas_call(
            kernel,
            out_shape=jax.ShapeDtypeStruct((rows, H), dtype),
            grid_spec=pltpu.PrefetchScalarGridSpec(
                num_scalar_prefetch=0,
                grid=(grid,),
                in_specs=[
                    row_spec,   # x tile
                    row_spec,   # residual tile
                    w_spec,     # resident transposed weight
                    ln_spec,    # packed LN params
                ],
                out_specs=pl.BlockSpec((row_tile, H), lambda i: (i, 0)),
            ),
            compiler_params=pltpu.CompilerParams(
                dimension_semantics=("parallel",),
                vmem_limit_bytes=vmem_limit),
        )(x2, r2, w_t, ln_params)

    try:
        out2 = run(*make_const_specs(True))
    except Exception:
        # Fallback if this JAX version rejects Buffered(1) on constant blocks.
        out2 = run(*make_const_specs(False))

    return out2.reshape(B, S, H)


def _reference(hidden_states, input_tensor, dense_weight,
               ln1_gamma, ln1_beta, ln2_gamma, ln2_beta,
               eps=1e-12, fix_attention_residual=False):
    h = jnp.einsum("bsh,oh->bso", hidden_states, dense_weight)

    def ln(x, g, b):
        m = jnp.mean(x, axis=-1, keepdims=True)
        v = jnp.mean((x - m) ** 2, axis=-1, keepdims=True)
        return (x - m) / jnp.sqrt(v + eps) * g + b

    y1 = ln(h + input_tensor, ln1_gamma, ln1_beta)
    if fix_attention_residual:
        return y1
    return ln(y1 + input_tensor, ln2_gamma, ln2_beta)


if __name__ == "__main__":
    # Small shapes consistent with the module: batch=2, seq=8, hidden=32.
    B, S, H = 2, 8, 32
    eps = 1e-12

    key = jax.random.PRNGKey(0)
    k1, k2, k3 = jax.random.split(key, 3)

    hidden_states = jax.random.normal(k1, (B, S, H), dtype=jnp.float32)
    input_tensor = jax.random.normal(k2, (B, S, H), dtype=jnp.float32)

    dense_weight = jax.random.normal(k3, (H, H), dtype=jnp.float32) / jnp.sqrt(H)
    ln1_gamma = jnp.ones((H,), dtype=jnp.float32)
    ln1_beta = jnp.zeros((H,), dtype=jnp.float32)
    ln2_gamma = jnp.ones((H,), dtype=jnp.float32)
    ln2_beta = jnp.zeros((H,), dtype=jnp.float32)

    # Default module config: fix_attention_residual=False (two LayerNorms).
    out = ribonanzanet_self_output(
        hidden_states, input_tensor, dense_weight,
        ln1_gamma, ln1_beta, ln2_gamma, ln2_beta,
        eps=eps, fix_attention_residual=False)
    out = jax.block_until_ready(out)
    ref = _reference(hidden_states, input_tensor, dense_weight,
                     ln1_gamma, ln1_beta, ln2_gamma, ln2_beta,
                     eps=eps, fix_attention_residual=False)
    assert out.shape == (B, S, H)
    assert jnp.allclose(out, ref, atol=1e-4, rtol=1e-4), "mismatch (two LN path)"

    # Also exercise the fix_attention_residual=True (single LayerNorm) path.
    out1 = ribonanzanet_self_output(
        hidden_states, input_tensor, dense_weight,
        ln1_gamma, ln1_beta,
        eps=eps, fix_attention_residual=True)
    out1 = jax.block_until_ready(out1)
    ref1 = _reference(hidden_states, input_tensor, dense_weight,
                      ln1_gamma, ln1_beta, ln2_gamma, ln2_beta,
                      eps=eps, fix_attention_residual=True)
    assert jnp.allclose(out1, ref1, atol=1e-4, rtol=1e-4), "mismatch (one LN path)"

    print("KERNEL_OK")
</pallas_src>

<mosaic_0001>
module attributes {stable_mosaic.version = 11 : i64} {
  func.func @_self_output_kernel(%arg0: i32, %arg1: memref<8x32xf32, #tpu.memory_space<vmem>>, %arg2: memref<8x32xf32, #tpu.memory_space<vmem>>, %arg3: memref<32x32xf32, #tpu.memory_space<vmem>>, %arg4: memref<4x32xf32, #tpu.memory_space<vmem>>, %arg5: memref<8x32xf32, #tpu.memory_space<vmem>>) attributes {dimension_semantics = [#tpu.dimension_semantics<parallel>], iteration_bounds = array<i64: 2>, scalar_prefetch = 0 : i64, scratch_operands = 0 : i64, tpu.core_type = #tpu.core_type<tc>, window_params = [{transform_indices = @transform_0, window_bounds = array<i64: 8, 32>}, {transform_indices = @transform_1, window_bounds = array<i64: 8, 32>}, {pipeline_mode = #tpu.pipeline_mode<synchronous>, transform_indices = @transform_2, window_bounds = array<i64: 32, 32>}, {pipeline_mode = #tpu.pipeline_mode<synchronous>, transform_indices = @transform_3, window_bounds = array<i64: 4, 32>}, {transform_indices = @transform_4, window_bounds = array<i64: 8, 32>}]} {
    %c0 = arith.constant 0 : index
    %c0_0 = arith.constant 0 : index
    %0 = vector.load %arg1[%c0, %c0_0] : memref<8x32xf32, #tpu.memory_space<vmem>>, vector<8x32xf32>
    %c0_1 = arith.constant 0 : index
    %c0_2 = arith.constant 0 : index
    %1 = vector.load %arg3[%c0_1, %c0_2] : memref<32x32xf32, #tpu.memory_space<vmem>>, vector<32x32xf32>
    %cst = arith.constant dense<0.000000e+00> : vector<8x32xf32>
    %2 = tpu.matmul %0, %1, %cst {dimension_numbers = #tpu.dot_dimension_numbers<[1], [0], [0], [1], [0, 0, 1, 1], [], []>} : vector<8x32xf32>, vector<32x32xf32>, vector<8x32xf32> -> vector<8x32xf32>
    %c0_3 = arith.constant 0 : index
    %c0_4 = arith.constant 0 : index
    %3 = vector.load %arg2[%c0_3, %c0_4] : memref<8x32xf32, #tpu.memory_space<vmem>>, vector<8x32xf32>
    %c0_5 = arith.constant 0 : index
    %c0_6 = arith.constant 0 : index
    %4 = vector.load %arg4[%c0_5, %c0_6] : memref<4x32xf32, #tpu.memory_space<vmem>>, vector<1x32xf32>
    %c1 = arith.constant 1 : index
    %c0_7 = arith.constant 0 : index
    %5 = vector.load %arg4[%c1, %c0_7] : memref<4x32xf32, #tpu.memory_space<vmem>>, vector<1x32xf32>
    %6 = arith.addf %2, %3 : vector<8x32xf32>
    %cst_8 = arith.constant dense<0.000000e+00> : vector<8xf32>
    %7 = vector.multi_reduction <add>, %6, %cst_8 [1] : vector<8x32xf32> to vector<8xf32>
    %8 = vector.shape_cast %7 : vector<8xf32> to vector<8x1xf32>
    %cst_9 = arith.constant 3.125000e-02 : f32
    %9 = vector.broadcast %cst_9 : f32 to vector<8x1xf32>
    %10 = arith.mulf %8, %9 : vector<8x1xf32>
    %11 = vector.broadcast %10 : vector<8x1xf32> to vector<8x32xf32>
    %12 = arith.subf %6, %11 : vector<8x32xf32>
    %13 = arith.mulf %12, %12 : vector<8x32xf32>
    %cst_10 = arith.constant dense<0.000000e+00> : vector<8xf32>
    %14 = vector.multi_reduction <add>, %13, %cst_10 [1] : vector<8x32xf32> to vector<8xf32>
    %15 = vector.shape_cast %14 : vector<8xf32> to vector<8x1xf32>
    %cst_11 = arith.constant 3.125000e-02 : f32
    %16 = vector.broadcast %cst_11 : f32 to vector<8x1xf32>
    %17 = arith.mulf %15, %16 : vector<8x1xf32>
    %cst_12 = arith.constant 9.99999996E-13 : f32
    %18 = vector.broadcast %cst_12 : f32 to vector<8x1xf32>
    %19 = arith.addf %17, %18 : vector<8x1xf32>
    %20 = math.rsqrt %19 : vector<8x1xf32>
    %21 = vector.broadcast %20 : vector<8x1xf32> to vector<8x32xf32>
    %22 = arith.mulf %12, %21 : vector<8x32xf32>
    %23 = vector.broadcast %4 : vector<1x32xf32> to vector<8x32xf32>
    %24 = arith.mulf %22, %23 : vector<8x32xf32>
    %25 = vector.broadcast %5 : vector<1x32xf32> to vector<8x32xf32>
    %26 = arith.addf %24, %25 : vector<8x32xf32>
    %c2 = arith.constant 2 : index
    %c0_13 = arith.constant 0 : index
    %27 = vector.load %arg4[%c2, %c0_13] : memref<4x32xf32, #tpu.memory_space<vmem>>, vector<1x32xf32>
    %c3 = arith.constant 3 : index
    %c0_14 = arith.constant 0 : index
    %28 = vector.load %arg4[%c3, %c0_14] : memref<4x32xf32, #tpu.memory_space<vmem>>, vector<1x32xf32>
    %29 = arith.addf %26, %3 : vector<8x32xf32>
    %cst_15 = arith.constant dense<0.000000e+00> : vector<8xf32>
    %30 = vector.multi_reduction <add>, %29, %cst_15 [1] : vector<8x32xf32> to vector<8xf32>
    %31 = vector.shape_cast %30 : vector<8xf32> to vector<8x1xf32>
    %cst_16 = arith.constant 3.125000e-02 : f32
    %32 = vector.broadcast %cst_16 : f32 to vector<8x1xf32>
    %33 = arith.mulf %31, %32 : vector<8x1xf32>
    %34 = vector.broadcast %33 : vector<8x1xf32> to vector<8x32xf32>
    %35 = arith.subf %29, %34 : vector<8x32xf32>
    %36 = arith.mulf %35, %35 : vector<8x32xf32>
    %cst_17 = arith.constant dense<0.000000e+00> : vector<8xf32>
    %37 = vector.multi_reduction <add>, %36, %cst_17 [1] : vector<8x32xf32> to vector<8xf32>
    %38 = vector.shape_cast %37 : vector<8xf32> to vector<8x1xf32>
    %cst_18 = arith.constant 3.125000e-02 : f32
    %39 = vector.broadcast %cst_18 : f32 to vector<8x1xf32>
    %40 = arith.mulf %38, %39 : vector<8x1xf32>
    %cst_19 = arith.constant 9.99999996E-13 : f32
    %41 = vector.broadcast %cst_19 : f32 to vector<8x1xf32>
    %42 = arith.addf %40, %41 : vector<8x1xf32>
    %43 = math.rsqrt %42 : vector<8x1xf32>
    %44 = vector.broadcast %43 : vector<8x1xf32> to vector<8x32xf32>
    %45 = arith.mulf %35, %44 : vector<8x32xf32>
    %46 = vector.broadcast %27 : vector<1x32xf32> to vector<8x32xf32>
    %47 = arith.mulf %45, %46 : vector<8x32xf32>
    %48 = vector.broadcast %28 : vector<1x32xf32> to vector<8x32xf32>
    %49 = arith.addf %47, %48 : vector<8x32xf32>
    %c0_20 = arith.constant 0 : index
    %c0_21 = arith.constant 0 : index
    %50 = vector.load %arg5[%c0_20, %c0_21] : memref<8x32xf32, #tpu.memory_space<vmem>>, vector<8x32xf32>
    tpu.vector_store %arg5[%c0_20, %c0_21], %49 {strides = array<i32>} : memref<8x32xf32, #tpu.memory_space<vmem>>, vector<8x32xf32>,
    return
  }
  func.func @transform_0(%arg0: i32) -> (i32, i32) {
    %c0_i32 = arith.constant 0 : i32
    %c0_i32_0 = arith.constant 0 : i32
    return %arg0, %c0_i32 : i32, i32
  }
  func.func @transform_1(%arg0: i32) -> (i32, i32) {
    %c0_i32 = arith.constant 0 : i32
    %c0_i32_0 = arith.constant 0 : i32
    return %arg0, %c0_i32 : i32, i32
  }
  func.func @transform_2(%arg0: i32) -> (i32, i32) {
    %c0_i32 = arith.constant 0 : i32
    %c0_i32_0 = arith.constant 0 : i32
    %c0_i32_1 = arith.constant 0 : i32
    return %c0_i32, %c0_i32_0 : i32, i32
  }
  func.func @transform_3(%arg0: i32) -> (i32, i32) {
    %c0_i32 = arith.constant 0 : i32
    %c0_i32_0 = arith.constant 0 : i32
    %c0_i32_1 = arith.constant 0 : i32
    return %c0_i32, %c0_i32_0 : i32, i32
  }
  func.func @transform_4(%arg0: i32) -> (i32, i32) {
    %c0_i32 = arith.constant 0 : i32
    %c0_i32_0 = arith.constant 0 : i32
    return %arg0, %c0_i32 : i32, i32
  }
}

module attributes {stable_mosaic.version = 11 : i64} {
  func.func @_self_output_kernel(%arg0: i32, %arg1: memref<8x32xf32, #tpu.memory_space<vmem>>, %arg2: memref<8x32xf32, #tpu.memory_space<vmem>>, %arg3: memref<32x32xf32, #tpu.memory_space<vmem>>, %arg4: memref<4x32xf32, #tpu.memory_space<vmem>>, %arg5: memref<8x32xf32, #tpu.memory_space<vmem>>) attributes {dimension_semantics = [#tpu.dimension_semantics<parallel>], iteration_bounds = array<i64: 2>, scalar_prefetch = 0 : i64, scratch_operands = 0 : i64, tpu.core_type = #tpu.core_type<tc>, window_params = [{transform_indices = @transform_0, window_bounds = array<i64: 8, 32>}, {transform_indices = @transform_1, window_bounds = array<i64: 8, 32>}, {pipeline_mode = #tpu.pipeline_mode<synchronous>, transform_indices = @transform_2, window_bounds = array<i64: 32, 32>}, {pipeline_mode = #tpu.pipeline_mode<synchronous>, transform_indices = @transform_3, window_bounds = array<i64: 4, 32>}, {transform_indices = @transform_4, window_bounds = array<i64: 8, 32>}]} {
    %c0 = arith.constant 0 : index
    %c0_0 = arith.constant 0 : index
    %0 = vector.load %arg1[%c0, %c0_0] : memref<8x32xf32, #tpu.memory_space<vmem>>, vector<8x32xf32>
    %c0_1 = arith.constant 0 : index
    %c0_2 = arith.constant 0 : index
    %1 = vector.load %arg3[%c0_1, %c0_2] : memref<32x32xf32, #tpu.memory_space<vmem>>, vector<32x32xf32>
    %cst = arith.constant dense<0.000000e+00> : vector<8x32xf32>
    %2 = tpu.matmul %0, %1, %cst {dimension_numbers = #tpu.dot_dimension_numbers<[1], [0], [0], [1], [0, 0, 1, 1], [], []>} : vector<8x32xf32>, vector<32x32xf32>, vector<8x32xf32> -> vector<8x32xf32>
    %c0_3 = arith.constant 0 : index
    %c0_4 = arith.constant 0 : index
    %3 = vector.load %arg2[%c0_3, %c0_4] : memref<8x32xf32, #tpu.memory_space<vmem>>, vector<8x32xf32>
    %c0_5 = arith.constant 0 : index
    %c0_6 = arith.constant 0 : index
    %4 = vector.load %arg4[%c0_5, %c0_6] : memref<4x32xf32, #tpu.memory_space<vmem>>, vector<1x32xf32>
    %c1 = arith.constant 1 : index
    %c0_7 = arith.constant 0 : index
    %5 = vector.load %arg4[%c1, %c0_7] : memref<4x32xf32, #tpu.memory_space<vmem>>, vector<1x32xf32>
    %6 = arith.addf %2, %3 : vector<8x32xf32>
    %cst_8 = arith.constant dense<0.000000e+00> : vector<8xf32>
    %7 = vector.multi_reduction <add>, %6, %cst_8 [1] : vector<8x32xf32> to vector<8xf32>
    %8 = vector.shape_cast %7 : vector<8xf32> to vector<8x1xf32>
    %cst_9 = arith.constant 3.125000e-02 : f32
    %9 = vector.broadcast %cst_9 : f32 to vector<8x1xf32>
    %10 = arith.mulf %8, %9 : vector<8x1xf32>
    %11 = vector.broadcast %10 : vector<8x1xf32> to vector<8x32xf32>
    %12 = arith.subf %6, %11 : vector<8x32xf32>
    %13 = arith.mulf %12, %12 : vector<8x32xf32>
    %cst_10 = arith.constant dense<0.000000e+00> : vector<8xf32>
    %14 = vector.multi_reduction <add>, %13, %cst_10 [1] : vector<8x32xf32> to vector<8xf32>
    %15 = vector.shape_cast %14 : vector<8xf32> to vector<8x1xf32>
    %cst_11 = arith.constant 3.125000e-02 : f32
    %16 = vector.broadcast %cst_11 : f32 to vector<8x1xf32>
    %17 = arith.mulf %15, %16 : vector<8x1xf32>
    %cst_12 = arith.constant 9.99999996E-13 : f32
    %18 = vector.broadcast %cst_12 : f32 to vector<8x1xf32>
    %19 = arith.addf %17, %18 : vector<8x1xf32>
    %20 = math.rsqrt %19 : vector<8x1xf32>
    %21 = vector.broadcast %20 : vector<8x1xf32> to vector<8x32xf32>
    %22 = arith.mulf %12, %21 : vector<8x32xf32>
    %23 = vector.broadcast %4 : vector<1x32xf32> to vector<8x32xf32>
    %24 = arith.mulf %22, %23 : vector<8x32xf32>
    %25 = vector.broadcast %5 : vector<1x32xf32> to vector<8x32xf32>
    %26 = arith.addf %24, %25 : vector<8x32xf32>
    %c2 = arith.constant 2 : index
    %c0_13 = arith.constant 0 : index
    %27 = vector.load %arg4[%c2, %c0_13] : memref<4x32xf32, #tpu.memory_space<vmem>>, vector<1x32xf32>
    %c3 = arith.constant 3 : index
    %c0_14 = arith.constant 0 : index
    %28 = vector.load %arg4[%c3, %c0_14] : memref<4x32xf32, #tpu.memory_space<vmem>>, vector<1x32xf32>
    %29 = arith.addf %26, %3 : vector<8x32xf32>
    %cst_15 = arith.constant dense<0.000000e+00> : vector<8xf32>
    %30 = vector.multi_reduction <add>, %29, %cst_15 [1] : vector<8x32xf32> to vector<8xf32>
    %31 = vector.shape_cast %30 : vector<8xf32> to vector<8x1xf32>
    %cst_16 = arith.constant 3.125000e-02 : f32
    %32 = vector.broadcast %cst_16 : f32 to vector<8x1xf32>
    %33 = arith.mulf %31, %32 : vector<8x1xf32>
    %34 = vector.broadcast %33 : vector<8x1xf32> to vector<8x32xf32>
    %35 = arith.subf %29, %34 : vector<8x32xf32>
    %36 = arith.mulf %35, %35 : vector<8x32xf32>
    %cst_17 = arith.constant dense<0.000000e+00> : vector<8xf32>
    %37 = vector.multi_reduction <add>, %36, %cst_17 [1] : vector<8x32xf32> to vector<8xf32>
    %38 = vector.shape_cast %37 : vector<8xf32> to vector<8x1xf32>
    %cst_18 = arith.constant 3.125000e-02 : f32
    %39 = vector.broadcast %cst_18 : f32 to vector<8x1xf32>
    %40 = arith.mulf %38, %39 : vector<8x1xf32>
    %cst_19 = arith.constant 9.99999996E-13 : f32
    %41 = vector.broadcast %cst_19 : f32 to vector<8x1xf32>
    %42 = arith.addf %40, %41 : vector<8x1xf32>
    %43 = math.rsqrt %42 : vector<8x1xf32>
    %44 = vector.broadcast %43 : vector<8x1xf32> to vector<8x32xf32>
    %45 = arith.mulf %35, %44 : vector<8x32xf32>
    %46 = vector.broadcast %27 : vector<1x32xf32> to vector<8x32xf32>
    %47 = arith.mulf %45, %46 : vector<8x32xf32>
    %48 = vector.broadcast %28 : vector<1x32xf32> to vector<8x32xf32>
    %49 = arith.addf %47, %48 : vector<8x32xf32>
    %c0_20 = arith.constant 0 : index
    %c0_21 = arith.constant 0 : index
    %50 = vector.load %arg5[%c0_20, %c0_21] : memref<8x32xf32, #tpu.memory_space<vmem>>, vector<8x32xf32>
    tpu.vector_store %arg5[%c0_20, %c0_21], %49 {strides = array<i32>} : memref<8x32xf32, #tpu.memory_space<vmem>>, vector<8x32xf32>,
    return
  }
  func.func @transform_0(%arg0: i32) -> (i32, i32) {
    %c0_i32 = arith.constant 0 : i32
    %c0_i32_0 = arith.constant 0 : i32
    return %arg0, %c0_i32 : i32, i32
  }
  func.func @transform_1(%arg0: i32) -> (i32, i32) {
    %c0_i32 = arith.constant 0 : i32
    %c0_i32_0 = arith.constant 0 : i32
    return %arg0, %c0_i32 : i32, i32
  }
  func.func @transform_2(%arg0: i32) -> (i32, i32) {
    %c0_i32 = arith.constant 0 : i32
    %c0_i32_0 = arith.constant 0 : i32
    %c0_i32_1 = arith.constant 0 : i32
    return %c0_i32, %c0_i32_0 : i32, i32
  }
  func.func @transform_3(%arg0: i32) -> (i32, i32) {
    %c0_i32 = arith.constant 0 : i32
    %c0_i32_0 = arith.constant 0 : i32
    %c0_i32_1 = arith.constant 0 : i32
    return %c0_i32, %c0_i32_0 : i32, i32
  }
  func.func @transform_4(%arg0: i32) -> (i32, i32) {
    %c0_i32 = arith.constant 0 : i32
    %c0_i32_0 = arith.constant 0 : i32
    return %arg0, %c0_i32 : i32, i32
  }
}

</mosaic_0001>

<bundles_post_ra>
// kernel: tpu_custom_call.1
= control target key start
LH: loop header
LB: loop body
LE: loop exit
PB: predicated region body
PF: predicated region fallthrough
CT: control target
= control target key end

     0   :  { %s1025_s0 = inlined_call_operand.hbm [shape: f32[16,32], index: 0, kind: input, shape index: {}]   ;;  %s1026_s1 = inlined_call_operand.hbm [shape: f32[16,32], index: 1, kind: input, shape index: {}]   ;;  %s1027_s2 = inlined_call_operand.hbm [shape: f32[32,32], index: 2, kind: input, shape index: {}]   ;;  %s1028_s3 = inlined_call_operand.vmem [shape: f32[4,32], index: 3, kind: input, shape index: {}]   ;;  %s1029_s4 = inlined_call_operand.hbm [shape: f32[16,32], index: 4, kind: output, shape index: {}]  }
   0x1   :  { %1034 = sst [smem:[#allocation13_spill]] %s1027_s2 }
   0x2   :  { %9 = vsyncpa [#allocation3], 0 }
   0x3   :  { %11 = vsyncpa [#allocation3 + $0x1], 0 }
   0x4   :  { %12 = vsyncpa [#allocation6], 0 }
   0x5   :  { %14 = vsyncpa [#allocation6 + $0x1], 0 }
   0x6   :  { %15 = vsyncpa [#allocation4], 0 }
   0x7   :  { %17 = vsyncpa [#allocation4 + $0x1], 0  ;;  %s809_s15 = smov 0   ;;  %s811_s16 = smov 0  }
   0x8   :  { %s813_s17 = smov 0   ;;  %s815_s18 = smov 0  }
   0x9 LB: > { %s830_s19 = sadd.s32 4294967295, %s774_s18   ;;  %s512_s20 = sadd.s32 4294967294, %s774_s18   ;;  %s774_s18 = sphi %s815_s18, %s1053_s18   ;;  %s770_s17 = sphi %s813_s17, %s1052_s17   ;;  %s766_s16 = sphi %s811_s16, %s1051_s16   ;;  %s762_s15 = sphi %s809_s15, %s1050_s15  }
   0xa   : > { %p43_p0 = scmp.ne.s32.totalorder %s766_s16, %s762_s15  ;;  %p1030_p1 = scmp.eq.s32.totalorder %s830_s19, 0 }
   0xb   : > { %p141_p3 = scmp.eq.s32.totalorder %s512_s20, 1  ;;  %p513_p5 = scmp.ge.s32.totalorder %s774_s18, 1 }
   0xc   : > { %p839_p4 = por %p1030_p1, %p43_p0  ;;  %p148_p7 = scmp.lt.s32.totalorder %s774_s18, 3 }
   0xd   : > { %p844_p6 = por %p141_p3, %p43_p0  ;;  %s776_s24 = smov [#allocation7]  }
   0xe   : > { %s1035_s21 = scalar_select %p839_p4, 1, 0 }
   0xf   : > { %s1036_s22 = scalar_select %p844_p6, 1, 0 }
  0x10   : > { %p849_p8 = pnand %p513_p5, %p148_p7  ;;  %s160_s25 = sshll.u32 %s776_s24, 4  ;;  %s161_s25 = int_to_ptr.vmem [resolvable:$true] %s160_s25 }
  0x11   : > { %s863_s27 = sadd.s32 1, %s774_s18   ;;  %s30_s28 = sadd.s32 1, %s770_s17 }
  0x12   : > { %s1037_s23 = scalar_select %p849_p8, 1, 0 }
  0x13   : > { %p560_p9 = pneg %p849_p8  ;;  %s27_s29 = ssub.s32 %s774_s18, %s863_s27 }
  0x14   : > { %s631_s30 = scalar_lea.vmem %s161_s25, 512  ;;  %p639_p5 = scmp.lt.s32.totalorder %s161_s25, %s161_s25 }
  0x15   : > { %p858_p11 = pnand %p560_p9, %p1030_p1  ;;  %p632_p13 = scmp.ne.s32.totalorder %s161_s25, %s631_s30 }
  0x16   : > { %p640_p7 = scmp.lt.s32.totalorder %s631_s30, %s631_s30 }
  0x17   : > { %p622_p12 = pneg %p858_p11 }
  0x18   : > { %p641_p10 = por %p640_p7, %p639_p5 }
  0x19   : > { %p634_p0 = pnand %p632_p13, %p622_p12 }
  0x1b   : > { %p635_p3 = pneg %p634_p0 }
  0x1d   : > { %p642_p2 = pnand %p641_p10, %p635_p3 }
  0x1f   : > { %645 = shalt.err (!%p642_p2)
}
  0x20   : > { %s777_s5 = smov 128   ;;  %s778_s6 = smov 8  }
  0x21   : > { %s1039_s2 = sld [smem:[#allocation13_spill]]  ;;  %p28_p9 = scmp.eq.s32.totalorder %s27_s29, 0 }
  0x22   : > { %p37_p12 = scmp.ne.s32.totalorder %s770_s17, %s766_s16  ;;  %p38_p10 = scmp.eq.s32.totalorder %s774_s18, 0 }
  0x23   : > { %p576_p2 = scmp.lt.s32.totalorder %s774_s18, 2  ;;  %p1040_p0 = scmp.eq.s32.totalorder %s830_s19, 1 }
  0x24   : > { %s880_s9 = scalar_select %p28_p9, %s770_s17, %s30_s28  }
  0x25   : > { %p39_p13 = por %p38_p10, %p37_p12  ;;  %p884_p3 = por %p1040_p0, %p37_p12 }
  0x26   : > { %s177_s11 = sand.u32 1, %s770_s17   ;;  %s517_s12 = sshll.u32 %s774_s18, 7 }
  0x27   : > { %563 = dma.hbm_to_vmem [thread:$0]  (!%p858_p11), %s1039_s2, 512, %s161_s25, [#allocation6], %s777_s5, %s777_s5, %s778_s6  }
  0x28   : > { %s1041_s10 = scalar_select %p884_p3, 1, 0 }
  0x29   : > { %s890_s13 = sshll.u32 %s177_s11, 3  ;;  %s895_s24 = scalar_lea.hbm %s1025_s0, %s517_s12 }
  0x2a   : > { %s181_s25 = scalar_lea.vmem [#allocation2], %s890_s13  ;;  %p898_p11 = pnand %p576_p2, %p39_p13 }
  0x2b   : > { %s188_s26 = sshll.u32 %s181_s25, 4  ;;  %s905_s5 = scalar_lea.hbm %s1026_s1, %s517_s12  ;;  %s189_s26 = int_to_ptr.vmem [resolvable:$true] %s188_s26 }
  0x2c   : > { %s178_s6 = scalar_lea.sflag [#allocation3], %s177_s11  ;;  %s646_s7 = scalar_lea.hbm %s895_s24, 128 }
  0x2d   : > { %p647_p5 = scmp.ne.s32.totalorder %s895_s24, %s646_s7  ;;  %p648_p7 = pneg %p898_p11 }
  0x2e   : > { %s651_s20 = scalar_lea.hbm %s1025_s0, 256  ;;  %p652_p10 = scmp.lt.s32.totalorder %s895_s24, %s1025_s0 }
  0x2f   : > { %p649_p9 = pnand %p648_p7, %p647_p5  ;;  %p653_p2 = scmp.lt.s32.totalorder %s651_s20, %s646_s7 }
  0x31   : > { %p650_p12 = pneg %p649_p9  ;;  %p654_p13 = por %p653_p2, %p652_p10 }
  0x33   : > { %p655_p0 = pnand %p654_p13, %p650_p12 }
  0x35   : > { %658 = shalt.err (!%p655_p0)
}
  0x36   : > { %s659_s11 = scalar_lea.vmem %s189_s26, 128  ;;  %s779_s12 = smov [#allocation2]  }
  0x37   : > { %p660_p1 = scmp.ne.s32.totalorder %s189_s26, %s659_s11  ;;  %s664_s29 = sshll.u32 %s779_s12, 4  ;;  %s665_s29 = int_to_ptr.vmem [resolvable:$false] %s664_s29 }
  0x38   : > { %s666_s30 = scalar_lea.vmem %s665_s29, 256  ;;  %p667_p9 = scmp.lt.s32.totalorder %s189_s26, %s665_s29 }
  0x39   : > { %p662_p6 = pnand %p660_p1, %p648_p7  ;;  %p668_p3 = scmp.lt.s32.totalorder %s666_s30, %s659_s11 }
  0x3b   : > { %p663_p5 = pneg %p662_p6  ;;  %p669_p4 = por %p668_p3, %p667_p9 }
  0x3d   : > { %p670_p8 = pnand %p669_p4, %p663_p5 }
  0x3f   : > { %673 = shalt.err (!%p670_p8)
}
  0x40   : > { %567 = dma.hbm_to_vmem [thread:$0]  (!%p898_p11), %s895_s24, 128, %s189_s26, %s178_s6  }
  0x41   : > { %s195_s2 = sand.u32 1, %s774_s18   ;;  %s199_s7 = scalar_lea.vmem [#allocation5], %s890_s13 }
  0x42   : > { %s206_s8 = sshll.u32 %s199_s7, 4  ;;  %s196_s14 = scalar_lea.sflag [#allocation6], %s195_s2  ;;  %s207_s8 = int_to_ptr.vmem [resolvable:$true] %s206_s8 }
  0x43   : > { %s674_s20 = scalar_lea.hbm %s905_s5, 128  ;;  %s679_s12 = scalar_lea.hbm %s1026_s1, 256 }
  0x44   : > { %p675_p1 = scmp.ne.s32.totalorder %s905_s5, %s674_s20  ;;  %p680_p8 = scmp.lt.s32.totalorder %s905_s5, %s1026_s1 }
  0x45   : > { %p681_p3 = scmp.lt.s32.totalorder %s679_s12, %s674_s20 }
  0x46   : > { %p677_p4 = pnand %p675_p1, %p648_p7 }
  0x47   : > { %p682_p12 = por %p681_p3, %p680_p8 }
  0x48   : > { %p678_p6 = pneg %p677_p4 }
  0x4a   : > { %p683_p10 = pnand %p682_p12, %p678_p6 }
  0x4c   : > { %686 = shalt.err (!%p683_p10)
}
  0x4d   : > { %s687_s13 = scalar_lea.vmem %s207_s8, 128  ;;  %s780_s24 = smov [#allocation5]  }
  0x4e   : > { %p688_p2 = scmp.ne.s32.totalorder %s207_s8, %s687_s13  ;;  %s692_s26 = sshll.u32 %s780_s24, 4  ;;  %s693_s26 = int_to_ptr.vmem [resolvable:$false] %s692_s26 }
  0x4f   : > { %s694_s6 = scalar_lea.vmem %s693_s26, 256  ;;  %p695_p5 = scmp.lt.s32.totalorder %s207_s8, %s693_s26 }
  0x50   : > { %p690_p13 = pnand %p688_p2, %p648_p7  ;;  %p696_p9 = scmp.lt.s32.totalorder %s694_s6, %s687_s13 }
  0x52   : > { %p691_p0 = pneg %p690_p13  ;;  %p697_p1 = por %p696_p9, %p695_p5 }
  0x54   : > { %p698_p4 = pnand %p697_p1, %p691_p0 }
  0x56   : > { %701 = shalt.err (!%p698_p4)
}
  0x57   : > { %570 = dma.hbm_to_vmem [thread:$0]  (!%p898_p11), %s905_s5, 128, %s207_s8, %s196_s14  }
  0x58   : > { %p1043_p6 = scmp.ne.s32.totalorder %s1037_s23, 0 }
  0x59   : > { %s950_s2 = sand.u32 (!%p1043_p6), 1, %s766_s16   ;;  %p1044_p7 = scmp.ne.s32.totalorder (!%p1043_p6), %s1035_s21, 0 }
  0x5a   : > { %215 = sbr.rel (%p1043_p6) target bundleno = 937 (0x3a9), region = 36  ;;  %s953_s7 = sshll.u32 (!%p1043_p6), %s950_s2, 3 }
  0x5b   : > { %s218_s20 = scalar_lea.sflag (!%p1043_p6), [#allocation3], %s950_s2  ;;  %s221_s25 = scalar_lea.vmem (!%p1043_p6), [#allocation2], %s953_s7 }
  0x5f   : > { %745 = dma.done.wait (%p1044_p7), %s218_s20, 128  }
  0x60   : > { %747 = vsyncadd (%p1044_p7), %s218_s20, 4294967168  ;;  %s226_s23 = sand.u32 1, %s830_s19   ;;  %s230_s5 = scalar_lea.vmem [#allocation5], %s953_s7 }
  0x61   : > { %s227_s28 = scalar_lea.sflag [#allocation6], %s226_s23 }
  0x62   : > { %749 = dma.done.wait (%p1044_p7), %s227_s28, 128  }
  0x63   : > { %751 = vsyncadd (%p1044_p7), %s227_s28, 4294967168  ;;  %p1045_p11 = scmp.eq.s32.totalorder %s830_s19, 0 }
  0x65   : > { %753 = dma.done.wait (%p1045_p11), [#allocation6], 512   ;;  %p1046_p8 = pmov %p1045_p11 }
  0x66   : > { %v781_v0 = vmov 0.0   ;;  %vm782_vm0 = vmmov 0   ;;  %v268_v1 = vld [vmem:[#allocation7 + $0x18] sm:$0xff]  ;;  %v267_v2 = vld [vmem:[#allocation7 + $0x10] sm:$0xff]  ;;  %v266_v3 = vld [vmem:[#allocation7 + $0x8] sm:$0xff]  ;;  %vm272_vm1 = vcmask 261120  }
  0x67   : > { %755 = vsyncadd (%p1046_p8), [#allocation6], 4294966784  ;;  %539 = vmatprep.subr.mxu0 %v781_v0  ;;  %547 = vmatprep.mubr.msk.f32.mxu0 %vm782_vm0, %v781_v0  ;;  %v265_v4 = vld [vmem:[#allocation7] sm:$0xff]  ;;  %v269_v6 = vld [vmem:[%s230_s5] sm:$0xff]  ;;  %s531_s24 = sshll.u32 %s830_s19, 7  ;;  %s263_s26 = scalar_lea.vmem [#allocation8], %s953_s7 }
  0x68   : > { %540 = vmatpush3.msra.mxu0 %v268_v1  ;;  %v264_v5 = vld [vmem:[%s221_s25] sm:$0xff]  ;;  %s410_s6 = sshll.u32 %s263_s26, 4  ;;  %s408_s23 = scalar_lea.hbm %s1029_s4, %s531_s24  ;;  %s411_s6 = int_to_ptr.vmem [resolvable:$true] %s410_s6 }
  0x69   : > { %541 = vmatprep.subr.mxu0 %v781_v0  ;;  %v526_v20 = vld [vmem:[%s1028_s3] ss:$0 sm:$0xff]  ;;  %v527_v22 = vld [vmem:[%s1028_s3 + $0x1] ss:$0 sm:$0xff]  ;;  %v528_v36 = vld [vmem:[%s1028_s3 + $0x2] ss:$0 sm:$0xff] }
  0x6a   : > { %542 = vmatpush3.msra.mxu0 %v267_v2  ;;  %v529_v38 = vld [vmem:[%s1028_s3 + $0x3] ss:$0 sm:$0xff]  ;;  %s397_s28 = scalar_lea.sflag [#allocation4], %s950_s2  ;;  %s702_s5 = scalar_lea.vmem %s411_s6, 128 }
  0x6b   : > { %543 = vmatprep.subr.mxu0 %v781_v0  ;;  %p703_p3 = scmp.ne.s32.totalorder %s411_s6, %s702_s5  ;;  %p1047_p12 = scmp.ne.s32.totalorder %s1041_s10, 0 }
  0x6c   : > { %544 = vmatpush3.msra.mxu0 %v266_v3  ;;  %s783_s21 = smov [#allocation8]  }
  0x6d   : > { %545 = vmatprep.subr.mxu0 %v781_v0  ;;  %p704_p10 = pnand %p703_p3, %p1047_p12  ;;  %s706_s8 = sshll.u32 %s783_s21, 4  ;;  %s707_s8 = int_to_ptr.vmem [resolvable:$false] %s706_s8 }
  0x6e   : > { %546 = vmatpush3.msra.mxu0 %v265_v4  ;;  %s708_s19 = scalar_lea.vmem %s707_s8, 256  ;;  %p709_p13 = scmp.lt.s32.totalorder %s411_s6, %s707_s8 }
  0x6f   : > { %548 = vmatmul.mubr.msk.f32.vlgmr.msra.gmra.mxu0 %vm272_vm1, %v264_v5  ;;  %p705_p2 = pneg %p704_p10  ;;  %p710_p0 = scmp.lt.s32.totalorder %s708_s19, %s702_s5 }
  0x71   : > { %p711_p5 = por %p710_p0, %p709_p13 }
  0x73   : > { %p712_p9 = pnand %p711_p5, %p705_p2 }
 0x12f   : > { %v342_v7 = vpop.f32.mrf.mxu0 }
 0x130   : > { %v343_v8 = vadd.f32 %v342_v7, %v269_v6 }
 0x131   : > { %v549_v9 = vpop.f32.mrf.mxu0 }
 0x132   : > { %v346_v10 = vsel %vm272_vm1, %v343_v8, 0.0 }
 0x133   : > { %347 = vadd.xlane.f32.xlu0 %v346_v10 }
 0x1bc   : > { %v348_v11 = vpop.xlane.xlu0 %347 }
 0x1bd   : > { %v349_v12 = vmul.f32 0.03125, %v348_v11 }
 0x1bf   : > { %v350_v13 = vsub.f32 %v343_v8, %v349_v12 }
 0x1c1   : > { %v351_v14 = vmul.f32 %v350_v13, %v350_v13 }
 0x1c3   : > { %v352_v15 = vsel %vm272_vm1, %v351_v14, 0.0 }
 0x1c4   : > { %353 = vadd.xlane.f32.xlu0 %v352_v15 }
 0x24d   : > { %v354_v16 = vpop.xlane.xlu0 %353 }
 0x24e   : > { %v355_v17 = vmul.f32 0.03125, %v354_v16 }
 0x250   : > { %v356_v18 = vadd.f32 1e-12, %v355_v17 }
 0x252   : > { %616 = vrsqrt.f32 %v356_v18 }
 0x25f   : > { %v617_v19 = vpop.eup %616 }
 0x260   : > { %v358_v21 = vmul.f32 %v617_v19, %v350_v13 }
 0x262   : > { %v363_v23 = vmul.f32 %v526_v20, %v358_v21 }
 0x264   : > { %v368_v24 = vadd.f32 %v527_v22, %v363_v23 }
 0x266   : > { %v371_v25 = vadd.f32 %v368_v24, %v269_v6 }
 0x268   : > { %v372_v26 = vsel %vm272_vm1, %v371_v25, 0.0 }
 0x269   : > { %373 = vadd.xlane.f32.xlu1 %v372_v26 }
 0x2f2   : > { %v374_v27 = vpop.xlane.xlu1 %373 }
 0x2f3   : > { %v375_v28 = vmul.f32 0.03125, %v374_v27 }
 0x2f5   : > { %v376_v29 = vsub.f32 %v371_v25, %v375_v28 }
 0x2f7   : > { %v377_v30 = vmul.f32 %v376_v29, %v376_v29 }
 0x2f9   : > { %v378_v31 = vsel %vm272_vm1, %v377_v30, 0.0 }
 0x2fa   : > { %379 = vadd.xlane.f32.xlu1 %v378_v31 }
 0x383   : > { %v380_v32 = vpop.xlane.xlu1 %379 }
 0x384   : > { %v381_v33 = vmul.f32 0.03125, %v380_v32 }
 0x386   : > { %v382_v34 = vadd.f32 1e-12, %v381_v33 }
 0x388   : > { %618 = vrsqrt.f32 %v382_v34 }
 0x395   : > { %v619_v35 = vpop.eup %618 }
 0x396   : > { %v384_v37 = vmul.f32 %v619_v35, %v376_v29 }
 0x398   : > { %v389_v39 = vmul.f32 %v528_v36, %v384_v37 }
 0x39a   : > { %v394_v40 = vadd.f32 %v529_v38, %v389_v39 }
 0x39c   : > { %395 = vst.msk [vmem:[%s263_s26] sm:$0xff] %vm272_vm1, %v394_v40 }
 0x39d   : > { %715 = shalt.err (!%p712_p9)
}
 0x39e   : > { %s716_s7 = scalar_lea.hbm %s408_s23, 128  ;;  %s720_s11 = scalar_lea.hbm %s1029_s4, 256 }
 0x39f   : > { %p717_p1 = scmp.ne.s32.totalorder %s408_s23, %s716_s7  ;;  %p721_p7 = scmp.lt.s32.totalorder %s408_s23, %s1029_s4 }
 0x3a0   : > { %p722_p11 = scmp.lt.s32.totalorder %s720_s11, %s716_s7 }
 0x3a1   : > { %p718_p4 = pnand %p717_p1, %p1047_p12 }
 0x3a2   : > { %p723_p8 = por %p722_p11, %p721_p7 }
 0x3a3   : > { %p719_p6 = pneg %p718_p4 }
 0x3a5   : > { %p724_p3 = pnand %p723_p8, %p719_p6 }
 0x3a7   : > { %727 = shalt.err (!%p724_p3)
}
 0x3a8   : > { %558 = dma.vmem_to_hbm [thread:$0]  (%p1047_p12), %s411_s6, 128, %s408_s23, %s397_s28  }
 0x3a9 PF: > { %s422_s30 = sand.u32 1, %s762_s15   ;;  %p1048_p10 = scmp.ne.s32.totalorder %s1036_s22, 0 }
 0x3aa   : > { %p1049_p2 = scmp.ge.s32.totalorder %s774_s18, 2  ;;  %s423_s13 = scalar_lea.sflag [#allocation4], %s422_s30 }
 0x3ac   : > { %p572_p13 = pnand %p1049_p2, %p1048_p10 }
 0x3ae   : > { %p573_p0 = pneg %p572_p13 }
 0x3b0   : > { %757 = dma.done.wait (%p573_p0), %s423_s13, 128  }
 0x3b1   : > { %759 = vsyncadd (%p573_p0), %s423_s13, 4294967168  ;;  %p20_p5 = scmp.ge.s32.totalorder %s863_s27, 4   ;;  %s1050_s15 = smov %s766_s16 }
 0x3b2   : > { %s1051_s16 = smov %s770_s17  ;;  %s1052_s17 = smov %s880_s9 }
 0x3b3   : > { %s1053_s18 = smov %s863_s27  ;;  %22 = sbr.rel (!%p20_p5) target bundleno = 9 (0x9), region = 98 }
 0x3b8   :  { %428 = vsyncpa [#allocation3], 1 }
 0x3b9   :  { %430 = vsyncpa [#allocation3 + $0x1], 1 }
 0x3ba   :  { %431 = vsyncpa [#allocation6], 1 }
 0x3bb   :  { %433 = vsyncpa [#allocation6 + $0x1], 1 }
 0x3bc   :  { %434 = vsyncpa [#allocation4], 1 }
 0x3bd   :  { %436 = vsyncpa [#allocation4 + $0x1], 1 }

// kernel: tpu_custom_call.1
= control target key start
LH: loop header
LB: loop body
LE: loop exit
PB: predicated region body
PF: predicated region fallthrough
CT: control target
= control target key end

     0   :  { %s1025_s0 = inlined_call_operand.hbm [shape: f32[16,32], index: 0, kind: input, shape index: {}]   ;;  %s1026_s1 = inlined_call_operand.hbm [shape: f32[16,32], index: 1, kind: input, shape index: {}]   ;;  %s1027_s2 = inlined_call_operand.hbm [shape: f32[32,32], index: 2, kind: input, shape index: {}]   ;;  %s1028_s3 = inlined_call_operand.vmem [shape: f32[4,32], index: 3, kind: input, shape index: {}]   ;;  %s1029_s4 = inlined_call_operand.hbm [shape: f32[16,32], index: 4, kind: output, shape index: {}]  }
   0x1   :  { %1034 = sst [smem:[#allocation13_spill]] %s1027_s2 }
   0x2   :  { %9 = vsyncpa [#allocation3], 0 }
   0x3   :  { %11 = vsyncpa [#allocation3 + $0x1], 0 }
   0x4   :  { %12 = vsyncpa [#allocation6], 0 }
   0x5   :  { %14 = vsyncpa [#allocation6 + $0x1], 0 }
   0x6   :  { %15 = vsyncpa [#allocation4], 0 }
   0x7   :  { %17 = vsyncpa [#allocation4 + $0x1], 0  ;;  %s809_s15 = smov 0   ;;  %s811_s16 = smov 0  }
   0x8   :  { %s813_s17 = smov 0   ;;  %s815_s18 = smov 0  }
   0x9 LB: > { %s830_s19 = sadd.s32 4294967295, %s774_s18   ;;  %s512_s20 = sadd.s32 4294967294, %s774_s18   ;;  %s774_s18 = sphi %s815_s18, %s1053_s18   ;;  %s770_s17 = sphi %s813_s17, %s1052_s17   ;;  %s766_s16 = sphi %s811_s16, %s1051_s16   ;;  %s762_s15 = sphi %s809_s15, %s1050_s15  }
   0xa   : > { %p43_p0 = scmp.ne.s32.totalorder %s766_s16, %s762_s15  ;;  %p1030_p1 = scmp.eq.s32.totalorder %s830_s19, 0 }
   0xb   : > { %p141_p3 = scmp.eq.s32.totalorder %s512_s20, 1  ;;  %p513_p5 = scmp.ge.s32.totalorder %s774_s18, 1 }
   0xc   : > { %p839_p4 = por %p1030_p1, %p43_p0  ;;  %p148_p7 = scmp.lt.s32.totalorder %s774_s18, 3 }
   0xd   : > { %p844_p6 = por %p141_p3, %p43_p0  ;;  %s776_s24 = smov [#allocation7]  }
   0xe   : > { %s1035_s21 = scalar_select %p839_p4, 1, 0 }
   0xf   : > { %s1036_s22 = scalar_select %p844_p6, 1, 0 }
  0x10   : > { %p849_p8 = pnand %p513_p5, %p148_p7  ;;  %s160_s25 = sshll.u32 %s776_s24, 4  ;;  %s161_s25 = int_to_ptr.vmem [resolvable:$true] %s160_s25 }
  0x11   : > { %s863_s27 = sadd.s32 1, %s774_s18   ;;  %s30_s28 = sadd.s32 1, %s770_s17 }
  0x12   : > { %s1037_s23 = scalar_select %p849_p8, 1, 0 }
  0x13   : > { %p560_p9 = pneg %p849_p8  ;;  %s27_s29 = ssub.s32 %s774_s18, %s863_s27 }
  0x14   : > { %s631_s30 = scalar_lea.vmem %s161_s25, 512  ;;  %p639_p5 = scmp.lt.s32.totalorder %s161_s25, %s161_s25 }
  0x15   : > { %p858_p11 = pnand %p560_p9, %p1030_p1  ;;  %p632_p13 = scmp.ne.s32.totalorder %s161_s25, %s631_s30 }
  0x16   : > { %p640_p7 = scmp.lt.s32.totalorder %s631_s30, %s631_s30 }
  0x17   : > { %p622_p12 = pneg %p858_p11 }
  0x18   : > { %p641_p10 = por %p640_p7, %p639_p5 }
  0x19   : > { %p634_p0 = pnand %p632_p13, %p622_p12 }
  0x1b   : > { %p635_p3 = pneg %p634_p0 }
  0x1d   : > { %p642_p2 = pnand %p641_p10, %p635_p3 }
  0x1f   : > { %645 = shalt.err (!%p642_p2)
}
  0x20   : > { %s777_s5 = smov 128   ;;  %s778_s6 = smov 8  }
  0x21   : > { %s1039_s2 = sld [smem:[#allocation13_spill]]  ;;  %p28_p9 = scmp.eq.s32.totalorder %s27_s29, 0 }
  0x22   : > { %p37_p12 = scmp.ne.s32.totalorder %s770_s17, %s766_s16  ;;  %p38_p10 = scmp.eq.s32.totalorder %s774_s18, 0 }
  0x23   : > { %p576_p2 = scmp.lt.s32.totalorder %s774_s18, 2  ;;  %p1040_p0 = scmp.eq.s32.totalorder %s830_s19, 1 }
  0x24   : > { %s880_s9 = scalar_select %p28_p9, %s770_s17, %s30_s28  }
  0x25   : > { %p39_p13 = por %p38_p10, %p37_p12  ;;  %p884_p3 = por %p1040_p0, %p37_p12 }
  0x26   : > { %s177_s11 = sand.u32 1, %s770_s17   ;;  %s517_s12 = sshll.u32 %s774_s18, 7 }
  0x27   : > { %563 = dma.hbm_to_vmem [thread:$0]  (!%p858_p11), %s1039_s2, 512, %s161_s25, [#allocation6], %s777_s5, %s777_s5, %s778_s6  }
  0x28   : > { %s1041_s10 = scalar_select %p884_p3, 1, 0 }
  0x29   : > { %s890_s13 = sshll.u32 %s177_s11, 3  ;;  %s895_s24 = scalar_lea.hbm %s1025_s0, %s517_s12 }
  0x2a   : > { %s181_s25 = scalar_lea.vmem [#allocation2], %s890_s13  ;;  %p898_p11 = pnand %p576_p2, %p39_p13 }
  0x2b   : > { %s188_s26 = sshll.u32 %s181_s25, 4  ;;  %s905_s5 = scalar_lea.hbm %s1026_s1, %s517_s12  ;;  %s189_s26 = int_to_ptr.vmem [resolvable:$true] %s188_s26 }
  0x2c   : > { %s178_s6 = scalar_lea.sflag [#allocation3], %s177_s11  ;;  %s646_s7 = scalar_lea.hbm %s895_s24, 128 }
  0x2d   : > { %p647_p5 = scmp.ne.s32.totalorder %s895_s24, %s646_s7  ;;  %p648_p7 = pneg %p898_p11 }
  0x2e   : > { %s651_s20 = scalar_lea.hbm %s1025_s0, 256  ;;  %p652_p10 = scmp.lt.s32.totalorder %s895_s24, %s1025_s0 }
  0x2f   : > { %p649_p9 = pnand %p648_p7, %p647_p5  ;;  %p653_p2 = scmp.lt.s32.totalorder %s651_s20, %s646_s7 }
  0x31   : > { %p650_p12 = pneg %p649_p9  ;;  %p654_p13 = por %p653_p2, %p652_p10 }
  0x33   : > { %p655_p0 = pnand %p654_p13, %p650_p12 }
  0x35   : > { %658 = shalt.err (!%p655_p0)
}
  0x36   : > { %s659_s11 = scalar_lea.vmem %s189_s26, 128  ;;  %s779_s12 = smov [#allocation2]  }
  0x37   : > { %p660_p1 = scmp.ne.s32.totalorder %s189_s26, %s659_s11  ;;  %s664_s29 = sshll.u32 %s779_s12, 4  ;;  %s665_s29 = int_to_ptr.vmem [resolvable:$false] %s664_s29 }
  0x38   : > { %s666_s30 = scalar_lea.vmem %s665_s29, 256  ;;  %p667_p9 = scmp.lt.s32.totalorder %s189_s26, %s665_s29 }
  0x39   : > { %p662_p6 = pnand %p660_p1, %p648_p7  ;;  %p668_p3 = scmp.lt.s32.totalorder %s666_s30, %s659_s11 }
  0x3b   : > { %p663_p5 = pneg %p662_p6  ;;  %p669_p4 = por %p668_p3, %p667_p9 }
  0x3d   : > { %p670_p8 = pnand %p669_p4, %p663_p5 }
  0x3f   : > { %673 = shalt.err (!%p670_p8)
}
  0x40   : > { %567 = dma.hbm_to_vmem [thread:$0]  (!%p898_p11), %s895_s24, 128, %s189_s26, %s178_s6  }
  0x41   : > { %s195_s2 = sand.u32 1, %s774_s18   ;;  %s199_s7 = scalar_lea.vmem [#allocation5], %s890_s13 }
  0x42   : > { %s206_s8 = sshll.u32 %s199_s7, 4  ;;  %s196_s14 = scalar_lea.sflag [#allocation6], %s195_s2  ;;  %s207_s8 = int_to_ptr.vmem [resolvable:$true] %s206_s8 }
  0x43   : > { %s674_s20 = scalar_lea.hbm %s905_s5, 128  ;;  %s679_s12 = scalar_lea.hbm %s1026_s1, 256 }
  0x44   : > { %p675_p1 = scmp.ne.s32.totalorder %s905_s5, %s674_s20  ;;  %p680_p8 = scmp.lt.s32.totalorder %s905_s5, %s1026_s1 }
  0x45   : > { %p681_p3 = scmp.lt.s32.totalorder %s679_s12, %s674_s20 }
  0x46   : > { %p677_p4 = pnand %p675_p1, %p648_p7 }
  0x47   : > { %p682_p12 = por %p681_p3, %p680_p8 }
  0x48   : > { %p678_p6 = pneg %p677_p4 }
  0x4a   : > { %p683_p10 = pnand %p682_p12, %p678_p6 }
  0x4c   : > { %686 = shalt.err (!%p683_p10)
}
  0x4d   : > { %s687_s13 = scalar_lea.vmem %s207_s8, 128  ;;  %s780_s24 = smov [#allocation5]  }
  0x4e   : > { %p688_p2 = scmp.ne.s32.totalorder %s207_s8, %s687_s13  ;;  %s692_s26 = sshll.u32 %s780_s24, 4  ;;  %s693_s26 = int_to_ptr.vmem [resolvable:$false] %s692_s26 }
  0x4f   : > { %s694_s6 = scalar_lea.vmem %s693_s26, 256  ;;  %p695_p5 = scmp.lt.s32.totalorder %s207_s8, %s693_s26 }
  0x50   : > { %p690_p13 = pnand %p688_p2, %p648_p7  ;;  %p696_p9 = scmp.lt.s32.totalorder %s694_s6, %s687_s13 }
  0x52   : > { %p691_p0 = pneg %p690_p13  ;;  %p697_p1 = por %p696_p9, %p695_p5 }
  0x54   : > { %p698_p4 = pnand %p697_p1, %p691_p0 }
  0x56   : > { %701 = shalt.err (!%p698_p4)
}
  0x57   : > { %570 = dma.hbm_to_vmem [thread:$0]  (!%p898_p11), %s905_s5, 128, %s207_s8, %s196_s14  }
  0x58   : > { %p1043_p6 = scmp.ne.s32.totalorder %s1037_s23, 0 }
  0x59   : > { %s950_s2 = sand.u32 (!%p1043_p6), 1, %s766_s16   ;;  %p1044_p7 = scmp.ne.s32.totalorder (!%p1043_p6), %s1035_s21, 0 }
  0x5a   : > { %215 = sbr.rel (%p1043_p6) target bundleno = 937 (0x3a9), region = 36  ;;  %s953_s7 = sshll.u32 (!%p1043_p6), %s950_s2, 3 }
  0x5b   : > { %s218_s20 = scalar_lea.sflag (!%p1043_p6), [#allocation3], %s950_s2  ;;  %s221_s25 = scalar_lea.vmem (!%p1043_p6), [#allocation2], %s953_s7 }
  0x5f   : > { %745 = dma.done.wait (%p1044_p7), %s218_s20, 128  }
  0x60   : > { %747 = vsyncadd (%p1044_p7), %s218_s20, 4294967168  ;;  %s226_s23 = sand.u32 1, %s830_s19   ;;  %s230_s5 = scalar_lea.vmem [#allocation5], %s953_s7 }
  0x61   : > { %s227_s28 = scalar_lea.sflag [#allocation6], %s226_s23 }
  0x62   : > { %749 = dma.done.wait (%p1044_p7), %s227_s28, 128  }
  0x63   : > { %751 = vsyncadd (%p1044_p7), %s227_s28, 4294967168  ;;  %p1045_p11 = scmp.eq.s32.totalorder %s830_s19, 0 }
  0x65   : > { %753 = dma.done.wait (%p1045_p11), [#allocation6], 512   ;;  %p1046_p8 = pmov %p1045_p11 }
  0x66   : > { %v781_v0 = vmov 0.0   ;;  %vm782_vm0 = vmmov 0   ;;  %v268_v1 = vld [vmem:[#allocation7 + $0x18] sm:$0xff]  ;;  %v267_v2 = vld [vmem:[#allocation7 + $0x10] sm:$0xff]  ;;  %v266_v3 = vld [vmem:[#allocation7 + $0x8] sm:$0xff]  ;;  %vm272_vm1 = vcmask 261120  }
  0x67   : > { %755 = vsyncadd (%p1046_p8), [#allocation6], 4294966784  ;;  %539 = vmatprep.subr.mxu0 %v781_v0  ;;  %547 = vmatprep.mubr.msk.f32.mxu0 %vm782_vm0, %v781_v0  ;;  %v265_v4 = vld [vmem:[#allocation7] sm:$0xff]  ;;  %v269_v6 = vld [vmem:[%s230_s5] sm:$0xff]  ;;  %s531_s24 = sshll.u32 %s830_s19, 7  ;;  %s263_s26 = scalar_lea.vmem [#allocation8], %s953_s7 }
  0x68   : > { %540 = vmatpush3.msra.mxu0 %v268_v1  ;;  %v264_v5 = vld [vmem:[%s221_s25] sm:$0xff]  ;;  %s410_s6 = sshll.u32 %s263_s26, 4  ;;  %s408_s23 = scalar_lea.hbm %s1029_s4, %s531_s24  ;;  %s411_s6 = int_to_ptr.vmem [resolvable:$true] %s410_s6 }
  0x69   : > { %541 = vmatprep.subr.mxu0 %v781_v0  ;;  %v526_v20 = vld [vmem:[%s1028_s3] ss:$0 sm:$0xff]  ;;  %v527_v22 = vld [vmem:[%s1028_s3 + $0x1] ss:$0 sm:$0xff]  ;;  %v528_v36 = vld [vmem:[%s1028_s3 + $0x2] ss:$0 sm:$0xff] }
  0x6a   : > { %542 = vmatpush3.msra.mxu0 %v267_v2  ;;  %v529_v38 = vld [vmem:[%s1028_s3 + $0x3] ss:$0 sm:$0xff]  ;;  %s397_s28 = scalar_lea.sflag [#allocation4], %s950_s2  ;;  %s702_s5 = scalar_lea.vmem %s411_s6, 128 }
  0x6b   : > { %543 = vmatprep.subr.mxu0 %v781_v0  ;;  %p703_p3 = scmp.ne.s32.totalorder %s411_s6, %s702_s5  ;;  %p1047_p12 = scmp.ne.s32.totalorder %s1041_s10, 0 }
  0x6c   : > { %544 = vmatpush3.msra.mxu0 %v266_v3  ;;  %s783_s21 = smov [#allocation8]  }
  0x6d   : > { %545 = vmatprep.subr.mxu0 %v781_v0  ;;  %p704_p10 = pnand %p703_p3, %p1047_p12  ;;  %s706_s8 = sshll.u32 %s783_s21, 4  ;;  %s707_s8 = int_to_ptr.vmem [resolvable:$false] %s706_s8 }
  0x6e   : > { %546 = vmatpush3.msra.mxu0 %v265_v4  ;;  %s708_s19 = scalar_lea.vmem %s707_s8, 256  ;;  %p709_p13 = scmp.lt.s32.totalorder %s411_s6, %s707_s8 }
  0x6f   : > { %548 = vmatmul.mubr.msk.f32.vlgmr.msra.gmra.mxu0 %vm272_vm1, %v264_v5  ;;  %p705_p2 = pneg %p704_p10  ;;  %p710_p0 = scmp.lt.s32.totalorder %s708_s19, %s702_s5 }
  0x71   : > { %p711_p5 = por %p710_p0, %p709_p13 }
  0x73   : > { %p712_p9 = pnand %p711_p5, %p705_p2 }
 0x12f   : > { %v342_v7 = vpop.f32.mrf.mxu0 }
 0x130   : > { %v343_v8 = vadd.f32 %v342_v7, %v269_v6 }
 0x131   : > { %v549_v9 = vpop.f32.mrf.mxu0 }
 0x132   : > { %v346_v10 = vsel %vm272_vm1, %v343_v8, 0.0 }
 0x133   : > { %347 = vadd.xlane.f32.xlu0 %v346_v10 }
 0x1bc   : > { %v348_v11 = vpop.xlane.xlu0 %347 }
 0x1bd   : > { %v349_v12 = vmul.f32 0.03125, %v348_v11 }
 0x1bf   : > { %v350_v13 = vsub.f32 %v343_v8, %v349_v12 }
 0x1c1   : > { %v351_v14 = vmul.f32 %v350_v13, %v350_v13 }
 0x1c3   : > { %v352_v15 = vsel %vm272_vm1, %v351_v14, 0.0 }
 0x1c4   : > { %353 = vadd.xlane.f32.xlu0 %v352_v15 }
 0x24d   : > { %v354_v16 = vpop.xlane.xlu0 %353 }
 0x24e   : > { %v355_v17 = vmul.f32 0.03125, %v354_v16 }
 0x250   : > { %v356_v18 = vadd.f32 1e-12, %v355_v17 }
 0x252   : > { %616 = vrsqrt.f32 %v356_v18 }
 0x25f   : > { %v617_v19 = vpop.eup %616 }
 0x260   : > { %v358_v21 = vmul.f32 %v617_v19, %v350_v13 }
 0x262   : > { %v363_v23 = vmul.f32 %v526_v20, %v358_v21 }
 0x264   : > { %v368_v24 = vadd.f32 %v527_v22, %v363_v23 }
 0x266   : > { %v371_v25 = vadd.f32 %v368_v24, %v269_v6 }
 0x268   : > { %v372_v26 = vsel %vm272_vm1, %v371_v25, 0.0 }
 0x269   : > { %373 = vadd.xlane.f32.xlu1 %v372_v26 }
 0x2f2   : > { %v374_v27 = vpop.xlane.xlu1 %373 }
 0x2f3   : > { %v375_v28 = vmul.f32 0.03125, %v374_v27 }
 0x2f5   : > { %v376_v29 = vsub.f32 %v371_v25, %v375_v28 }
 0x2f7   : > { %v377_v30 = vmul.f32 %v376_v29, %v376_v29 }
 0x2f9   : > { %v378_v31 = vsel %vm272_vm1, %v377_v30, 0.0 }
 0x2fa   : > { %379 = vadd.xlane.f32.xlu1 %v378_v31 }
 0x383   : > { %v380_v32 = vpop.xlane.xlu1 %379 }
 0x384   : > { %v381_v33 = vmul.f32 0.03125, %v380_v32 }
 0x386   : > { %v382_v34 = vadd.f32 1e-12, %v381_v33 }
 0x388   : > { %618 = vrsqrt.f32 %v382_v34 }
 0x395   : > { %v619_v35 = vpop.eup %618 }
 0x396   : > { %v384_v37 = vmul.f32 %v619_v35, %v376_v29 }
 0x398   : > { %v389_v39 = vmul.f32 %v528_v36, %v384_v37 }
 0x39a   : > { %v394_v40 = vadd.f32 %v529_v38, %v389_v39 }
 0x39c   : > { %395 = vst.msk [vmem:[%s263_s26] sm:$0xff] %vm272_vm1, %v394_v40 }
 0x39d   : > { %715 = shalt.err (!%p712_p9)
}
 0x39e   : > { %s716_s7 = scalar_lea.hbm %s408_s23, 128  ;;  %s720_s11 = scalar_lea.hbm %s1029_s4, 256 }
 0x39f   : > { %p717_p1 = scmp.ne.s32.totalorder %s408_s23, %s716_s7  ;;  %p721_p7 = scmp.lt.s32.totalorder %s408_s23, %s1029_s4 }
 0x3a0   : > { %p722_p11 = scmp.lt.s32.totalorder %s720_s11, %s716_s7 }
 0x3a1   : > { %p718_p4 = pnand %p717_p1, %p1047_p12 }
 0x3a2   : > { %p723_p8 = por %p722_p11, %p721_p7 }
 0x3a3   : > { %p719_p6 = pneg %p718_p4 }
 0x3a5   : > { %p724_p3 = pnand %p723_p8, %p719_p6 }
 0x3a7   : > { %727 = shalt.err (!%p724_p3)
}
 0x3a8   : > { %558 = dma.vmem_to_hbm [thread:$0]  (%p1047_p12), %s411_s6, 128, %s408_s23, %s397_s28  }
 0x3a9 PF: > { %s422_s30 = sand.u32 1, %s762_s15   ;;  %p1048_p10 = scmp.ne.s32.totalorder %s1036_s22, 0 }
 0x3aa   : > { %p1049_p2 = scmp.ge.s32.totalorder %s774_s18, 2  ;;  %s423_s13 = scalar_lea.sflag [#allocation4], %s422_s30 }
 0x3ac   : > { %p572_p13 = pnand %p1049_p2, %p1048_p10 }
 0x3ae   : > { %p573_p0 = pneg %p572_p13 }
 0x3b0   : > { %757 = dma.done.wait (%p573_p0), %s423_s13, 128  }
 0x3b1   : > { %759 = vsyncadd (%p573_p0), %s423_s13, 4294967168  ;;  %p20_p5 = scmp.ge.s32.totalorder %s863_s27, 4   ;;  %s1050_s15 = smov %s766_s16 }
 0x3b2   : > { %s1051_s16 = smov %s770_s17  ;;  %s1052_s17 = smov %s880_s9 }
 0x3b3   : > { %s1053_s18 = smov %s863_s27  ;;  %22 = sbr.rel (!%p20_p5) target bundleno = 9 (0x9), region = 98 }
 0x3b8   :  { %428 = vsyncpa [#allocation3], 1 }
 0x3b9   :  { %430 = vsyncpa [#allocation3 + $0x1], 1 }
 0x3ba   :  { %431 = vsyncpa [#allocation6], 1 }
 0x3bb   :  { %433 = vsyncpa [#allocation6 + $0x1], 1 }
 0x3bc   :  { %434 = vsyncpa [#allocation4], 1 }
 0x3bd   :  { %436 = vsyncpa [#allocation4 + $0x1], 1 }

</bundles_post_ra>
